<compile_context>
chip_gen: v7x
topology: tpu7x:2x2x1
jax: 0.10.0
libtpu: 0.0.40
codegen_flags: <defaults>
</compile_context>

<pallas_src>
import functools
import math

import jax
import jax.numpy as jnp
from jax.experimental import pallas as pl
from jax.experimental.pallas import tpu as pltpu


def _round_up(x: int, m: int) -> int:
    return ((x + m - 1) // m) * m


# ---------------------------------------------------------------------------
# Kernels
# ---------------------------------------------------------------------------

def _zgd_lane_dense_kernel(c_ref, o_ref, *, g, D, row_tile, block_invariant):
    """Block is (row_tile, 128) over the row-major flattened array.

    Element with global flat index f is the 0-th cepstral coefficient iff
    f % D == 0.  When row_tile*128 % D == 0 the mask is identical for every
    block and does not depend on program_id (loop-invariant on the grid).
    """
    c = c_ref[...]
    sub = jax.lax.broadcasted_iota(jnp.int32, c.shape, 0)
    lane = jax.lax.broadcasted_iota(jnp.int32, c.shape, 1)
    flat = sub * 128 + lane
    if not block_invariant:
        # int32 flat index; fine for arrays < 2**31 elements.
        flat = flat + pl.program_id(0) * (row_tile * 128)
    is_c0 = (flat % D) == 0
    transformed = ((c.astype(jnp.float32) - 1.0) * g).astype(c.dtype)
    o_ref[...] = jnp.where(is_c0, transformed, c)


def _zgd_wide_rows_kernel(c_ref, o_ref, *, g, D):
    """Block is (row_tile, W) with W == k*D (the full last dim); a column is
    the 0-th coefficient iff (column % D) == 0."""
    c = c_ref[...]
    lane = jax.lax.broadcasted_iota(jnp.int32, c.shape, 1)
    is_c0 = (lane % D) == 0
    transformed = ((c.astype(jnp.float32) - 1.0) * g).astype(c.dtype)
    o_ref[...] = jnp.where(is_c0, transformed, c)


# ---------------------------------------------------------------------------
# Wrapper
# ---------------------------------------------------------------------------

def zeroth_gamma_division(c: jax.Array, cep_order: int, gamma: float, *,
                          donate: bool = False,
                          block_bytes: int = 4 << 20) -> jax.Array:
    """Pallas TPU implementation of ZerothGammaDivision.forward."""
    assert c.shape[-1] == cep_order + 1, "last dim must be cep_order + 1"
    g = 1.0 / gamma

    orig_shape = c.shape
    D = orig_shape[-1]
    total = math.prod(orig_shape)
    if total == 0:
        return c

    itemsize = jnp.dtype(c.dtype).itemsize
    sub_mult = max(8, 32 // itemsize)            # 8 f32 / 16 bf16 / 32 int8
    io_alias = {0: 0} if donate else {}
    cparams = pltpu.CompilerParams(
        dimension_semantics=("parallel",),
        # 2x double-buffered (in + out) 4 MiB tiles ~= 16 MiB; raise v5e's
        # 16 MiB default and leave headroom everywhere (<= v7x physical).
        vmem_limit_bytes=32 * 1024 * 1024,
    )

    if total % 128 == 0:
        # ---- lane-dense fast path: view as (M, 128) ----
        M = total // 128
        c2d = c.reshape(M, 128)
        target_rows = max(sub_mult, block_bytes // (128 * itemsize))
        # Rows per repetition of the "flat % D == 0" pattern; quantizing the
        # block row count to it makes the mask block-invariant.
        period = D // math.gcd(D, 128)
        row_quant = sub_mult * period // math.gcd(sub_mult, period)  # lcm
        if M <= target_rows:
            row_tile = M                          # single block (full dim)
            block_invariant = True
        elif row_quant <= target_rows:
            row_tile = (target_rows // row_quant) * row_quant
            block_invariant = True
        else:                                     # pathological D: keep modulo
            row_tile = (target_rows // sub_mult) * sub_mult
            block_invariant = False
        grid = (pl.cdiv(M, row_tile),)

        kernel = functools.partial(
            _zgd_lane_dense_kernel, g=g, D=D, row_tile=row_tile,
            block_invariant=block_invariant)
        out2d = pl.pallas_call(
            kernel,
            out_shape=jax.ShapeDtypeStruct((M, 128), c2d.dtype),
            grid_spec=pltpu.PrefetchScalarGridSpec(
                num_scalar_prefetch=0,
                grid=grid,
                in_specs=[pl.BlockSpec((row_tile, 128), lambda i: (i, 0))],
                out_specs=pl.BlockSpec((row_tile, 128), lambda i: (i, 0)),
            ),
            input_output_aliases=io_alias,
            compiler_params=cparams,
        )(c2d)
        return out2d.reshape(orig_shape)

    # ---- general path: widen rows to W = k*D (k | N) so the store width is
    #      lane-dense even for small D; W is the full last dim, so any width
    #      is legal for the BlockSpec. ----
    N = total // D
    max_width = 2048
    k = 1
    for kk in range(max(1, min(N, max_width // max(D, 1))), 0, -1):
        if N % kk == 0:
            k = kk
            break
    W = k * D
    N2 = N // k
    c2d = c.reshape(N2, W)
    # VMEM lane-pads the last dim to a multiple of 128 -> size rows with that.
    row_bytes = _round_up(W, 128) * itemsize
    target_rows = max(sub_mult, block_bytes // row_bytes)
    row_tile = N2 if N2 <= target_rows else (target_rows // sub_mult) * sub_mult
    grid = (pl.cdiv(N2, row_tile),)

    kernel = functools.partial(_zgd_wide_rows_kernel, g=g, D=D)
    out2d = pl.pallas_call(
        kernel,
        out_shape=jax.ShapeDtypeStruct((N2, W), c2d.dtype),
        grid_spec=pltpu.PrefetchScalarGridSpec(
            num_scalar_prefetch=0,
            grid=grid,
            in_specs=[pl.BlockSpec((row_tile, W), lambda i: (i, 0))],
            out_specs=pl.BlockSpec((row_tile, W), lambda i: (i, 0)),
        ),
        input_output_aliases=io_alias,
        compiler_params=cparams,
    )(c2d)
    return out2d.reshape(orig_shape)


def zeroth_gamma_division_ref(c, cep_order, gamma):
    """Pure-JAX reference mirroring the PyTorch forward."""
    g = 1.0 / gamma
    return jnp.concatenate([(c[..., :1] - 1.0) * g, c[..., 1:]], axis=-1)


if __name__ == "__main__":
    k0, k1, k2, k3 = jax.random.split(jax.random.PRNGKey(0), 4)

    # Case 1: lane-dense path, single block (total % 128 == 0).
    cep_order, gamma = 15, -0.5
    c = jax.random.normal(k0, (2, 8, cep_order + 1), dtype=jnp.float32)
    out = jax.block_until_ready(zeroth_gamma_division(c, cep_order, gamma))
    ref = zeroth_gamma_division_ref(c, cep_order, gamma)
    assert out.shape == c.shape
    assert jnp.allclose(out, ref, atol=1e-6, rtol=1e-6), "case1 mismatch"

    # Case 2: lane-dense path, several blocks + partial edge block
    # (tiny block_bytes -> row_tile=8, M=30 -> grid of 4 with a short tail).
    cep_order, gamma = 31, 0.5
    c = jax.random.normal(k1, (3, 40, cep_order + 1), dtype=jnp.float32)
    out = jax.block_until_ready(
        zeroth_gamma_division(c, cep_order, gamma, block_bytes=8 * 128 * 4))
    ref = zeroth_gamma_division_ref(c, cep_order, gamma)
    assert jnp.allclose(out, ref, atol=1e-6, rtol=1e-6), "case2 mismatch"

    # Case 3: general path (total % 128 != 0; small D widened to k*D).
    cep_order, gamma = 9, 0.25
    c = jax.random.normal(k2, (3, 7, cep_order + 1), dtype=jnp.float32)
    out = jax.block_until_ready(zeroth_gamma_division(c, cep_order, gamma))
    ref = zeroth_gamma_division_ref(c, cep_order, gamma)
    assert out.shape == c.shape
    assert jnp.allclose(out, ref, atol=1e-6, rtol=1e-6), "case3 mismatch"

    # Case 4: bf16 input — pass-through lanes are bit-exact; the transformed
    # lane is computed in f32 and rounded once.
    cep_order, gamma = 15, -0.5
    c = jax.random.normal(k3, (4, 8, cep_order + 1), dtype=jnp.bfloat16)
    out = jax.block_until_ready(zeroth_gamma_division(c, cep_order, gamma))
    ref = zeroth_gamma_division_ref(c.astype(jnp.float32), cep_order, gamma)
    assert out.dtype == jnp.bfloat16
    assert bool(jnp.all(out[..., 1:] == c[..., 1:])), "case4 passthrough mismatch"
    assert jnp.allclose(out.astype(jnp.float32), ref, atol=3e-2, rtol=3e-2), \
        "case4 mismatch"

    print("KERNEL_OK")
</pallas_src>

<mosaic_0001>
module attributes {stable_mosaic.version = 11 : i64} {
  func.func @_zgd_lane_dense_kernel(%arg0: i32, %arg1: memref<2x128xf32, #tpu.memory_space<vmem>>, %arg2: memref<2x128xf32, #tpu.memory_space<vmem>>) attributes {dimension_semantics = [#tpu.dimension_semantics<parallel>], iteration_bounds = array<i64: 1>, scalar_prefetch = 0 : i64, scratch_operands = 0 : i64, tpu.core_type = #tpu.core_type<tc>, window_params = [{transform_indices = @transform_0, window_bounds = array<i64: 2, 128>}, {transform_indices = @transform_1, window_bounds = array<i64: 2, 128>}]} {
    %c0 = arith.constant 0 : index
    %c0_0 = arith.constant 0 : index
    %0 = vector.load %arg1[%c0, %c0_0] : memref<2x128xf32, #tpu.memory_space<vmem>>, vector<2x128xf32>
    %1 = tpu.iota {dimensions = array<i32: 0>} : vector<2x128xi32>
    %2 = tpu.iota {dimensions = array<i32: 1>} : vector<2x128xi32>
    %c128_i32 = arith.constant 128 : i32
    %3 = vector.broadcast %c128_i32 : i32 to vector<2x128xi32>
    %4 = arith.muli %1, %3 : vector<2x128xi32>
    %5 = arith.addi %4, %2 : vector<2x128xi32>
    %c16_i32 = arith.constant 16 : i32
    %c0_i32 = arith.constant 0 : i32
    %6 = arith.cmpi eq, %c16_i32, %c0_i32 : i32
    %c1_i32 = arith.constant 1 : i32
    %7 = arith.select %6, %c1_i32, %c16_i32 : i32
    %8 = vector.broadcast %7 : i32 to vector<2x128xi32>
    %9 = arith.remsi %5, %8 : vector<2x128xi32>
    %c0_i32_1 = arith.constant 0 : i32
    %10 = vector.broadcast %c0_i32_1 : i32 to vector<2x128xi32>
    %11 = arith.cmpi ne, %9, %10 : vector<2x128xi32>
    %c0_i32_2 = arith.constant 0 : i32
    %12 = vector.broadcast %c0_i32_2 : i32 to vector<2x128xi32>
    %13 = arith.cmpi slt, %9, %12 : vector<2x128xi32>
    %c0_i32_3 = arith.constant 0 : i32
    %14 = arith.cmpi slt, %7, %c0_i32_3 : i32
    %15 = vector.broadcast %14 : i1 to vector<2x128xi1>
    %16 = vector.broadcast %15 : vector<2x128xi1> to vector<2x128xi1>
    %17 = arith.xori %13, %16 : vector<2x128xi1>
    %18 = arith.andi %17, %11 : vector<2x128xi1>
    %19 = vector.broadcast %7 : i32 to vector<2x128xi32>
    %20 = arith.addi %9, %19 : vector<2x128xi32>
    %21 = arith.select %18, %20, %9 : vector<2x128xi1>, vector<2x128xi32>
    %c0_i32_4 = arith.constant 0 : i32
    %22 = vector.broadcast %c0_i32_4 : i32 to vector<2x128xi32>
    %23 = arith.cmpi eq, %21, %22 : vector<2x128xi32>
    %cst = arith.constant 1.000000e+00 : f32
    %24 = vector.broadcast %cst : f32 to vector<2x128xf32>
    %25 = arith.subf %0, %24 : vector<2x128xf32>
    %cst_5 = arith.constant -2.000000e+00 : f32
    %26 = vector.broadcast %cst_5 : f32 to vector<2x128xf32>
    %27 = arith.mulf %25, %26 : vector<2x128xf32>
    %28 = arith.select %23, %27, %0 : vector<2x128xi1>, vector<2x128xf32>
    %c0_6 = arith.constant 0 : index
    %c0_7 = arith.constant 0 : index
    %29 = vector.load %arg2[%c0_6, %c0_7] : memref<2x128xf32, #tpu.memory_space<vmem>>, vector<2x128xf32>
    tpu.vector_store %arg2[%c0_6, %c0_7], %28 {strides = array<i32>} : memref<2x128xf32, #tpu.memory_space<vmem>>, vector<2x128xf32>,
    return
  }
  func.func @transform_0(%arg0: i32) -> (i32, i32) {
    %c0_i32 = arith.constant 0 : i32
    %c0_i32_0 = arith.constant 0 : i32
    return %arg0, %c0_i32 : i32, i32
  }
  func.func @transform_1(%arg0: i32) -> (i32, i32) {
    %c0_i32 = arith.constant 0 : i32
    %c0_i32_0 = arith.constant 0 : i32
    return %arg0, %c0_i32 : i32, i32
  }
}

</mosaic_0001>

<bundles_post_ra>
// kernel: tpu_custom_call.1
= control target key start
LH: loop header
LB: loop body
LE: loop exit
PB: predicated region body
PF: predicated region fallthrough
CT: control target
= control target key end

     0   :  { %6 = vsyncpa [#allocation3], 0  ;;  %s148_s0 = inlined_call_operand.hbm [shape: f32[2,128], index: 0, kind: input, shape index: {}]   ;;  %s149_s1 = inlined_call_operand.hbm [shape: f32[2,128], index: 1, kind: output, shape index: {}]  }
   0x1   :  { %7 = vsyncpa [#allocation4], 0  ;;  %s112_s6 = smov [#allocation2]   ;;  %s64_s10 = scalar_lea.hbm %s148_s0, 32 }
   0x2   :  { %s14_s7 = sshll.u32 %s112_s6, 4  ;;  %p65_p0 = scmp.ne.s32.totalorder %s148_s0, %s64_s10  ;;  %s15_s7 = int_to_ptr.vmem [resolvable:$true] %s14_s7 }
   0x3   :  { %p68_p1 = scmp.lt.u32.totalorder %s64_s10, %s148_s0 }
   0x5   :  { %p70_p2 = pnand %p68_p1, %p65_p0 }
   0x7   :  { %73 = shalt.err (!%p70_p2)
}
   0x8   :  { %s74_s15 = scalar_lea.vmem %s15_s7, 32  ;;  %p79_p4 = scmp.lt.s32.totalorder %s15_s7, %s15_s7 }
   0x9   :  { %p75_p3 = scmp.ne.s32.totalorder %s15_s7, %s74_s15  ;;  %p80_p5 = scmp.lt.s32.totalorder %s74_s15, %s74_s15 }
   0xb   :  { %p81_p6 = por %p80_p5, %p79_p4 }
   0xd   :  { %p82_p7 = pnand %p81_p6, %p75_p3 }
   0xf   :  { %85 = shalt.err (!%p82_p7)
}
  0x10   :  { %17 = dma.hbm_to_vmem [thread:$0]  %s148_s0, 32, %s15_s7, [#allocation3]  }
  0x11   :  { %108 = dma.done.wait [#allocation3], 32  }
  0x12   :  { %109 = vsyncadd [#allocation3], 4294967264  ;;  %v22_v0 = vlaneseq  ;;  %v21_v6 = vld [vmem:[#allocation2] sm:$0x3]  ;;  %s113_s0 = smov [#allocation5]  }
  0x13   :  { %v61_v9 = vadd.f32 -1.0, %v21_v6  ;;  %s51_s18 = sshll.u32 %s113_s0, 4  ;;  %s52_s18 = int_to_ptr.vmem [resolvable:$true] %s51_s18 }
  0x14   :  { %v23_v1 = vshrl.u32 %v22_v0, 7  ;;  %v25_v2 = vand.u32 127, %v22_v0  ;;  %s86_s19 = scalar_lea.vmem %s52_s18, 32  ;;  %p91_p9 = scmp.lt.s32.totalorder %s52_s18, %s52_s18 }
  0x15   :  { %v42_v13 = vmul.f32 -2.0, %v61_v9  ;;  %p87_p8 = scmp.ne.s32.totalorder %s52_s18, %s86_s19  ;;  %p92_p10 = scmp.lt.s32.totalorder %s86_s19, %s86_s19 }
  0x16   :  { %v26_v3 = vmul.u32 128, %v23_v1 }
  0x17   :  { %p93_p11 = por %p92_p10, %p91_p9 }
  0x18   :  { %v27_v4 = vadd.s32 %v26_v3, %v25_v2 }
  0x19   :  { %p94_p12 = pnand %p93_p11, %p87_p8 }
  0x1a   :  { %v29_v5 = vsub.s32 0, %v27_v4  ;;  %vm28_vm0 = vcmp.lt.s32.totalorder %v27_v4, 0 }
  0x1c   :  { %v60_v7 = vmin.u32 %v29_v5, %v27_v4 }
  0x1e   :  { %v32_v8 = vand.u32 15, %v60_v7 }
  0x20   :  { %v33_v10 = vsub.s32 0, %v32_v8 }
  0x22   :  { %v34_v11 = vsel %vm28_vm0, %v33_v10, %v32_v8 }
  0x23   :  { %vm35_vm1 = vcmp.ne.s32.totalorder %v34_v11, 0  ;;  %vm36_vm2 = vcmp.lt.s32.totalorder %v34_v11, 0  ;;  %v38_v12 = vadd.s32 16, %v34_v11 }
  0x24   :  { %vm37_vm3 = vmand %vm36_vm2, %vm35_vm1 }
  0x25   :  { %v39_v14 = vsel %vm37_vm3, %v38_v12, %v34_v11 }
  0x26   :  { %vm40_vm4 = vcmp.eq.s32.totalorder %v39_v14, 0 }
  0x27   :  { %v43_v15 = vsel %vm40_vm4, %v42_v13, %v21_v6 }
  0x28   :  { %44 = vst [vmem:[#allocation5] sm:$0x3] %v43_v15 }
  0x29   :  { %97 = shalt.err (!%p94_p12)
}
  0x2a   :  { %s98_s22 = scalar_lea.hbm %s149_s1, 32 }
  0x2b   :  { %p99_p13 = scmp.ne.s32.totalorder %s149_s1, %s98_s22  ;;  %p102_p0 = scmp.lt.u32.totalorder %s98_s22, %s149_s1 }
  0x2d   :  { %p104_p1 = pnand %p102_p0, %p99_p13 }
  0x2f   :  { %107 = shalt.err (!%p104_p1)
}
  0x30   :  { %54 = dma.vmem_to_hbm [thread:$0]  %s52_s18, 32, %s149_s1, [#allocation4]  }
  0x31   :  { %110 = dma.done.wait [#allocation4], 32  }
  0x32   :  { %111 = vsyncadd [#allocation4], 4294967264 }
  0x33   :  { %58 = vsyncpa [#allocation3], 1 }
  0x34   :  { %59 = vsyncpa [#allocation4], 1 }

</bundles_post_ra>
